<compile_context>
chip_gen: v5e
topology: v5e:2x2
jax: 0.10.0
libtpu: 0.0.40
codegen_flags: <defaults>
</compile_context>

<pallas_src>
import math
import functools

import jax
import jax.numpy as jnp
from jax.experimental import pallas as pl
from jax.experimental.pallas import tpu as pltpu


def _get_slopes(heads):
    def get_slopes_power_of_2(n):
        start = 2 ** (-(2 ** (-(math.log2(n) - 3))))
        ratio = start
        return [start * ratio ** i for i in range(n)]

    if math.log2(heads).is_integer():
        return get_slopes_power_of_2(heads)
    closest_power_of_2 = 2 ** math.floor(math.log2(heads))
    return (
        get_slopes_power_of_2(closest_power_of_2)
        + get_slopes_power_of_2(2 * closest_power_of_2)[0::2][: heads - closest_power_of_2]
    )


def _alibi_kernel(neg_slopes_ref, out_ref, dist_ref, *, row_offset):
    # Grid = (row-tile ti, col-tile tj, head h); head is innermost/"arbitrary".
    # out_ref view: (1, bi, bj) block for (head h, row-tile ti, col-tile tj).
    # dist_ref: (bi, bj) f32 VMEM scratch holding |col - row - row_offset|,
    # computed once per (ti, tj) and reused for every head.
    ti = pl.program_id(0)
    tj = pl.program_id(1)
    h = pl.program_id(2)
    bi, bj = dist_ref.shape

    @pl.when(h == 0)
    def _():
        # Scalar offset folded once: dist = |col_iota - row_iota + base|,
        # computed exactly in int32 then converted once to f32.
        base = tj * bj - ti * bi - row_offset
        rows = jax.lax.broadcasted_iota(jnp.int32, (bi, bj), 0)
        cols = jax.lax.broadcasted_iota(jnp.int32, (bi, bj), 1)
        dist_ref[...] = jnp.abs(cols - rows + base).astype(jnp.float32)

    # Negation already folded into the (prefetched, SMEM) slope; zero slopes
    # reproduce the zero-padded "unalibied" heads.
    out_ref[0, :, :] = (dist_ref[...] * neg_slopes_ref[h]).astype(out_ref.dtype)


def _pick_tile(dim, max_tile):
    # Full-dim block is always legal; otherwise use max_tile, which is already
    # (8,128)-aligned for its axis.
    return dim if dim <= max_tile else max_tile


def alibi_positional_bias(
    i, j, heads, total_heads, *, tile_i=512, tile_j=2048, out_dtype=jnp.float32
):
    """Returns the ALiBi bias tensor of shape (total_heads, i, j)."""
    assert j >= i, "ALiBi assumes j >= i (keys at least as long as queries)"
    assert tile_i % 8 == 0 and tile_j % 128 == 0, "tiles must be (8,128)-aligned"

    # Negated slopes so the kernel only does dist * neg_slope.
    neg_slopes = jnp.zeros((total_heads,), dtype=jnp.float32)
    neg_slopes = neg_slopes.at[:heads].set(
        -jnp.asarray(_get_slopes(heads), dtype=jnp.float32)
    )

    bi = _pick_tile(i, tile_i)
    bj = _pick_tile(j, tile_j)
    # (ti, tj) lead as "parallel" for megacore balance; heads innermost and
    # "arbitrary" so the dist scratch is reused across heads.
    grid = (pl.cdiv(i, bi), pl.cdiv(j, bj), total_heads)

    kernel = functools.partial(_alibi_kernel, row_offset=j - i)

    grid_spec = pltpu.PrefetchScalarGridSpec(
        num_scalar_prefetch=1,
        grid=grid,
        in_specs=[],
        out_specs=pl.BlockSpec((1, bi, bj), lambda ti, tj, h, slopes: (h, ti, tj)),
        scratch_shapes=[pltpu.VMEM((bi, bj), jnp.float32)],
    )

    out_bytes = total_heads * i * j * jnp.dtype(out_dtype).itemsize
    cost = pl.CostEstimate(
        flops=8 * total_heads * i * j,
        transcendentals=0,
        bytes_accessed=out_bytes + total_heads * 4,
    )

    out = pl.pallas_call(
        kernel,
        grid_spec=grid_spec,
        out_shape=jax.ShapeDtypeStruct((total_heads, i, j), out_dtype),
        compiler_params=pltpu.CompilerParams(
            dimension_semantics=("parallel", "parallel", "arbitrary")
        ),
        cost_estimate=cost,
    )(neg_slopes)
    return out


def _reference(i, j, heads, total_heads):
    # Pure-JAX reference of the PyTorch forward pass (f32).
    slopes = jnp.asarray(_get_slopes(heads), dtype=jnp.float32).reshape(heads, 1, 1)
    i_arange = jnp.arange(j - i, j, dtype=jnp.float32)
    j_arange = jnp.arange(j, dtype=jnp.float32)
    bias = -jnp.abs(j_arange[None, None, :] - i_arange[None, :, None])  # (1, i, j)
    bias = bias * slopes                                                # (heads, i, j)
    pad = total_heads - heads
    bias = jnp.pad(bias, ((0, pad), (0, 0), (0, 0)))
    return bias


if __name__ == "__main__":
    key = jax.random.PRNGKey(0)  # no random inputs needed; kept per spec
    del key

    # Small case: single full-dim block per head (module-exact f32).
    heads, total_heads, i, j = 4, 8, 8, 8
    out = jax.block_until_ready(alibi_positional_bias(i, j, heads, total_heads))
    ref = _reference(i, j, heads, total_heads)
    assert out.shape == (total_heads, i, j) and out.dtype == jnp.float32
    assert jnp.allclose(out, ref, atol=1e-6, rtol=1e-6)

    # Tiled case: multiple (i, j) tiles incl. a partial row tile, non-power-of-2
    # head count, padded (zero-slope) heads, scratch reuse across heads.
    heads2, total_heads2, i2, j2 = 3, 4, 40, 256
    out2 = jax.block_until_ready(
        alibi_positional_bias(i2, j2, heads2, total_heads2, tile_i=16, tile_j=128)
    )
    ref2 = _reference(i2, j2, heads2, total_heads2)
    assert out2.shape == (total_heads2, i2, j2) and out2.dtype == jnp.float32
    assert jnp.allclose(out2, ref2, atol=1e-6, rtol=1e-6)

    # Optional bf16 output path (halves HBM write traffic; looser tolerance).
    out3 = jax.block_until_ready(
        alibi_positional_bias(i2, j2, heads2, total_heads2, out_dtype=jnp.bfloat16)
    )
    assert out3.dtype == jnp.bfloat16
    assert jnp.allclose(out3.astype(jnp.float32), ref2, atol=1e-1, rtol=1e-2)

    print("KERNEL_OK")
</pallas_src>

<mosaic_0001>
module attributes {stable_mosaic.version = 11 : i64} {
  func.func @_alibi_kernel(%arg0: i32, %arg1: i32, %arg2: i32, %arg3: memref<8xf32, #tpu.memory_space<smem>>, %arg4: memref<1x8x8xf32, #tpu.memory_space<vmem>>, %arg5: memref<8x8xf32, #tpu.memory_space<vmem>>) attributes {dimension_semantics = [#tpu.dimension_semantics<parallel>, #tpu.dimension_semantics<parallel>, #tpu.dimension_semantics<arbitrary>], iteration_bounds = array<i64: 1, 1, 8>, scalar_prefetch = 1 : i64, scratch_operands = 1 : i64, tpu.core_type = #tpu.core_type<tc>, window_params = [{transform_indices = @transform_0, window_bounds = array<i64: 1, 8, 8>}]} {
    %c0_i32 = arith.constant 0 : i32
    %0 = arith.cmpi eq, %arg2, %c0_i32 : i32
    %1 = arith.extui %0 : i1 to i32
    %c0_i32_0 = arith.constant 0 : i32
    %2 = arith.cmpi ne, %1, %c0_i32_0 : i32
    scf.if %2 {
      %c8_i32 = arith.constant 8 : i32
      %11 = arith.muli %arg1, %c8_i32 : i32
      %c8_i32_5 = arith.constant 8 : i32
      %12 = arith.muli %arg0, %c8_i32_5 : i32
      %13 = arith.subi %11, %12 : i32
      %c0_i32_6 = arith.constant 0 : i32
      %14 = arith.subi %13, %c0_i32_6 : i32
      %15 = tpu.iota {dimensions = array<i32: 0>} : vector<8x8xi32>
      %16 = tpu.iota {dimensions = array<i32: 1>} : vector<8x8xi32>
      %17 = arith.subi %16, %15 : vector<8x8xi32>
      %18 = vector.broadcast %14 : i32 to vector<8x8xi32>
      %19 = arith.addi %17, %18 : vector<8x8xi32>
      %20 = math.absi %19 : vector<8x8xi32>
      %21 = arith.sitofp %20 : vector<8x8xi32> to vector<8x8xf32>
      %c0_7 = arith.constant 0 : index
      %c0_8 = arith.constant 0 : index
      %22 = vector.load %arg5[%c0_7, %c0_8] : memref<8x8xf32, #tpu.memory_space<vmem>>, vector<8x8xf32>
      tpu.vector_store %arg5[%c0_7, %c0_8], %21 {strides = array<i32>} : memref<8x8xf32, #tpu.memory_space<vmem>>, vector<8x8xf32>,
    } else {
    }
    %c0 = arith.constant 0 : index
    %c0_1 = arith.constant 0 : index
    %3 = vector.load %arg5[%c0, %c0_1] : memref<8x8xf32, #tpu.memory_space<vmem>>, vector<8x8xf32>
    %4 = arith.index_cast %arg2 : i32 to index
    %5 = memref.load %arg3[%4] : memref<8xf32, #tpu.memory_space<smem>>
    %6 = vector.broadcast %5 : f32 to vector<8x8xf32>
    %7 = arith.mulf %3, %6 : vector<8x8xf32>
    %c0_2 = arith.constant 0 : index
    %c0_3 = arith.constant 0 : index
    %c0_4 = arith.constant 0 : index
    %8 = vector.load %arg4[%c0_2, %c0_3, %c0_4] : memref<1x8x8xf32, #tpu.memory_space<vmem>>, vector<1x8x8xf32>
    %9 = vector.shape_cast %8 : vector<1x8x8xf32> to vector<8x8xf32>
    %10 = vector.shape_cast %7 : vector<8x8xf32> to vector<1x8x8xf32>
    tpu.vector_store %arg4[%c0_2, %c0_3, %c0_4], %10 {strides = array<i32>} : memref<1x8x8xf32, #tpu.memory_space<vmem>>, vector<1x8x8xf32>,
    return
  }
  func.func @transform_0(%arg0: i32, %arg1: i32, %arg2: i32, %arg3: memref<8xf32, #tpu.memory_space<smem>>) -> (i32, i32, i32) {
    %c0_i32 = arith.constant 0 : i32
    return %arg2, %arg0, %arg1 : i32, i32, i32
  }
}

</mosaic_0001>

<bundles_post_ra>
// kernel: tpu_custom_call.1
= control target key start
LH: loop header
LB: loop body
LE: loop exit
PB: predicated region body
PF: predicated region fallthrough
CT: control target
= control target key end

     0   :  { %s294_s9 = smov [#allocation4]   ;;  %s375_s0 = inlined_call_operand.hbm [shape: f32[8], index: 0, kind: input, shape index: {}]   ;;  %s376_s1 = inlined_call_operand.hbm [shape: f32[8,8,8], index: 1, kind: output, shape index: {}]  }
   0x1   :  { %s7_s8 = sshll.u32 %s375_s0, 4  ;;  %s8_s8 = int_to_ptr.hbm [resolvable:$true] %s7_s8 }
   0x2   :  { %10 = dma.hbm_to_smem %s8_s8, 16, %s294_s9, [#allocation3] }
   0x3   :  { %272 = dma.done.wait [#allocation3], 16 }
   0x4   :  { %273 = vsyncadd [#allocation3], 4294967280 }
   0x5   :  { %13 = sfence }
   0x6   :  { %14 = vsyncpa [#allocation6], 0 }
   0x7   :  { %16 = vsyncpa [#allocation6 + $0x1], 0  ;;  %s308_s10 = smov 0   ;;  %s310_s11 = smov 0  }
   0x8   :  { %s312_s12 = smov 0   ;;  %s314_s13 = smov 0  }
   0x9 LB: > { %s30_s0 = sadd.s32 1, %s288_s12  ;;  %s167_s14 = sadd.s32 4294967295, %s292_s13   ;;  %s292_s13 = sphi %s314_s13, %s22_s13   ;;  %s288_s12 = sphi %s312_s12, %s381_s12   ;;  %s284_s11 = sphi %s310_s11, %s380_s11   ;;  %s280_s10 = sphi %s308_s10, %s379_s10  }
   0xa   : > { %p31_p0 = scmp.ge.s32.totalorder %s30_s0, 8  ;;  %p57_p1 = scmp.ne.s32.totalorder %s284_s11, %s280_s10 }
   0xb   : > { %s48_s15 = sadd.s32 1, %s284_s11  ;;  %p58_p2 = scmp.eq.s32.totalorder %s167_s14, 7 }
   0xc   : > { %s383_s0 = smov (%p31_p0, %s30_s0), 0  ;;  %p52_p3 = scmp.eq.s32.totalorder %s292_s13, 7 }
   0xd   : > { %s41_s16 = ssub.s32 %s288_s12, %s383_s0  ;;  %p338_p6 = por %p58_p2, %p57_p1 }
   0xe   : > { %p46_p4 = scmp.eq.s32.totalorder %s41_s16, 0  ;;  %p168_p5 = scmp.ne.s32.totalorder %s41_s16, 0 }
   0xf   : > { %p169_p8 = scmp.ge.s32.totalorder %s292_s13, 8 }
  0x10   : > { %s343_s18 = scalar_select %p46_p4, %s284_s11, %s48_s15  }
  0x11   : > { %p345_p7 = por %p168_p5, %p52_p3  ;;  %67 = sbr.rel (%p169_p8) target bundleno = 50 (0x32), region = 12 }
  0x12   : > { %s72_s20 = sand.u32 (!%p169_p8), 1, %s284_s11   ;;  %p171_p9 = scmp.ne.s32.totalorder (!%p169_p8), %s288_s12, 0 }
  0x13   : > { %s170_s21 = sshll.u32 (!%p169_p8), %s72_s20, 3 }
  0x14   : > { %s74_s22 = scalar_lea.vmem (!%p169_p8), [#allocation5], %s170_s21 }
  0x16   : > { %78 = sbr.rel (%p171_p9) target bundleno = 39 (0x27), region = 16 }
  0x1b   : > { %v82_v0 = vlaneseq  ;;  %vm93_vm1 = vcmask 64512  }
  0x1d   : > { %v83_v1 = vshrl.u32 %v82_v0, 7  ;;  %v85_v2 = vand.u32 127, %v82_v0 }
  0x1f   : > { %v86_v3 = vsub.s32 %v85_v2, %v83_v1 }
  0x21   : > { %vm89_vm0 = vcmp.lt.s32.totalorder %v86_v3, 0  ;;  %v90_v4 = vsub.s32 0, %v86_v3 }
  0x23   : > { %v91_v5 = vsel %vm89_vm0, %v90_v4, %v86_v3 }
  0x24   : > { %v92_v6 = vcvt.s32.f32 %v91_v5 }
  0x26   : > { %94 = vst.msk [vmem:[#allocation2] sm:$0xff] %vm93_vm1, %v92_v6 }
  0x27 PF: > { %s96_s23 = sld [smem:[#allocation4 + %s288_s12]]  ;;  %s173_s24 = sshll.u32 %s288_s12, 3  ;;  %vm99_vm2 = vcmask 64512  }
  0x28   : > { %s114_s27 = scalar_lea.hbm %s376_s1, %s173_s24  ;;  %s116_s28 = sshll.u32 %s74_s22, 4  ;;  %s117_s28 = int_to_ptr.vmem [resolvable:$true] %s116_s28 }
  0x29   : > { %s118_s29 = sshll.u32 %s114_s27, 4  ;;  %s102_s30 = scalar_lea.sflag [#allocation6], %s72_s20  ;;  %s119_s29 = int_to_ptr.hbm [resolvable:$true] %s118_s29 }
  0x2d   : > { %v95_v7 = vld [vmem:[#allocation2] sm:$0xff]  ;;  %v97_v8 = vstv %s96_s23 }
  0x2e   : > { %v98_v9 = vmul.f32 %v97_v8, %v95_v7 }
  0x30   : > { %100 = vst.msk [vmem:[%s74_s22] sm:$0xff] %vm99_vm2, %v98_v9 }
  0x31   : > { %176 = dma.vmem_to_hbm [thread:$0]  (%p345_p7), %s117_s28, 128, %s119_s29, %s102_s30  }
  0x32 PF: > { %p182_p10 = scmp.ge.s32.totalorder %s292_s13, 1  ;;  %s130_s2 = sand.u32 1, %s280_s10  }
  0x33   : > { %s131_s3 = scalar_lea.sflag [#allocation6], %s130_s2 }
  0x34   : > { %p179_p11 = pnand %p182_p10, %p338_p6 }
  0x36   : > { %p180_p12 = pneg %p179_p11 }
  0x38   : > { %275 = dma.done.wait (%p180_p12), %s131_s3, 128  }
  0x39   : > { %277 = vsyncadd (%p180_p12), %s131_s3, 4294967168  ;;  %s22_s13 = sadd.s32 1, %s292_s13   ;;  %s379_s10 = smov %s284_s11 }
  0x3a   : > { %p19_p13 = scmp.ge.s32.totalorder %s22_s13, 9   ;;  %s380_s11 = smov %s343_s18 }
  0x3b   : > { %s381_s12 = smov %s383_s0 }
  0x3c   :  { %21 = sbr.rel (!%p19_p13) target bundleno = 9 (0x9), region = 48 }
  0x41   :  { %137 = vsyncpa [#allocation6], 1 }
  0x42   :  { %139 = vsyncpa [#allocation6 + $0x1], 1 }

</bundles_post_ra>
